<compile_context>
chip_gen: v7x
topology: tpu7x:2x2x1
jax: 0.10.0
libtpu: 0.0.40
codegen_flags: <defaults>
</compile_context>

<pallas_src>
import functools

import jax
import jax.numpy as jnp
from jax.experimental import pallas as pl
from jax.experimental.pallas import tpu as pltpu


def _cnn2d_fused_kernel(xcol_ref, w_ref, b_ref, mask_ref, fcw_ref, fcb_ref, o_ref,
                        *, batch_tile, l_pad):
    """Fused conv(all filter sizes) + bias + ReLU + max-pool-over-time + Linear.

    xcol_ref : (TB*Lp, K)   im2col of embedded text, K = C * max_fs * E
    w_ref    : (K, NFS*F)   all conv filters, fs-zero-padded, stacked along N, pre-transposed
    b_ref    : (1, NFS*F)   conv biases (concatenated)
    mask_ref : (Lp, NFS*F)  additive mask: 0 where (time pos, filter) is a valid conv
                            position, -1e30 otherwise (shared across batch)
    fcw_ref  : (NFS*F, O)   fc weight, pre-transposed
    fcb_ref  : (1, O)       fc bias
    o_ref    : (TB, O)
    """
    # One MXU matmul covers every filter size at once.
    h = jnp.dot(xcol_ref[...], w_ref[...], preferred_element_type=jnp.float32)  # (TB*Lp, NF)
    h = jnp.maximum(h + b_ref[...], 0.0)                                        # bias + ReLU
    nf = h.shape[-1]
    h = h.reshape(batch_tile, l_pad, nf) + mask_ref[...][None, :, :]            # mask invalid pos.
    pooled = jnp.max(h, axis=1)                                                 # (TB, NF)
    o_ref[...] = (jnp.dot(pooled, fcw_ref[...], preferred_element_type=jnp.float32)
                  + fcb_ref[...]).astype(o_ref.dtype)


def _pick_batch_tile(n_batch, l_pad, k_dim):
    """Largest batch tile whose im2col block stays ~<= 4 MiB (double-buffered by Pallas)."""
    rows_budget = max(1, (4 << 20) // (k_dim * 4))
    tb = max(1, rows_budget // l_pad)
    if tb >= n_batch:
        return n_batch
    return max(8, (tb // 8) * 8)      # keep batch-tiled blocks sublane-aligned


def cnn2d_forward(text, params, filter_sizes, multi_channel):
    """text: [seq_len, batch] int32 (PyTorch layout). Returns [batch, output_dim]."""
    tokens = text.T                                   # permute(1, 0) -> (B, S)
    B, S = tokens.shape
    max_fs = max(filter_sizes)
    min_fs = min(filter_sizes)

    # Embedding gather (JAX glue) + channel stacking -> (B, C, S, E)
    chans = [params["embedding"][tokens]]
    if multi_channel:
        chans.append(params["embedding_multi"][tokens])
    x = jnp.stack(chans, axis=1)
    _, C, _, E = x.shape

    # patch_sentence: pad sequence up to the max filter size.
    # TODO(synk): PyTorch pads with uninitialized `.data.new(...)` memory; we pad with zeros.
    S_eff = max(S, max_fs)

    # im2col for the *largest* filter size; smaller filters reuse it via fs-zero-padded weights.
    L_max = S_eff - min_fs + 1                        # most conv positions of any filter size
    Lp = ((L_max + 7) // 8) * 8                       # pad time positions to a sublane multiple
    S_need = Lp + max_fs - 1
    x = jnp.pad(x, ((0, 0), (0, 0), (0, S_need - S), (0, 0)))

    cols = jnp.stack([x[:, :, dt:dt + Lp, :] for dt in range(max_fs)], axis=2)  # (B,C,max_fs,Lp,E)
    cols = jnp.transpose(cols, (0, 3, 1, 2, 4))                                 # (B,Lp,C,max_fs,E)
    K = C * max_fs * E
    xcol = cols.reshape(B * Lp, K).astype(jnp.float32)

    # Pack all conv weights: pad each (F, C, fs, E) to (F, C, max_fs, E), flatten to (K, F),
    # and concatenate along N so one matmul produces all filter sizes side by side.
    F_ = params["conv_w"][0].shape[0]
    w_cols, l_valid = [], []
    for i, fs in enumerate(filter_sizes):
        w = params["conv_w"][i]                                      # (F, C, fs, E)
        w = jnp.pad(w, ((0, 0), (0, 0), (0, max_fs - fs), (0, 0)))   # (F, C, max_fs, E)
        w_cols.append(w.reshape(F_, K).T)                            # (K, F)
        l_valid.append(S_eff - fs + 1)                               # valid conv positions
    w_all = jnp.concatenate(w_cols, axis=1)                          # (K, NFS*F)
    b_all = jnp.concatenate([params["conv_b"][i]
                             for i in range(len(filter_sizes))]).reshape(1, -1)
    NF = len(filter_sizes) * F_

    # Additive validity mask over (time position, filter column); broadcast over batch in-kernel.
    l_idx = jnp.arange(Lp, dtype=jnp.int32)[:, None]                         # (Lp, 1)
    thresh = jnp.repeat(jnp.asarray(l_valid, jnp.int32), F_)[None, :]        # (1, NFS*F)
    mask = jnp.where(l_idx < thresh, 0.0, -1e30).astype(jnp.float32)         # (Lp, NFS*F)

    fc_wT = params["fc_w"].T.astype(jnp.float32)                             # (NFS*F, O)
    fc_b = params["fc_b"].reshape(1, -1).astype(jnp.float32)
    O = fc_wT.shape[1]

    # Tile the grid over batch; pad batch to a multiple of the tile (padded rows sliced off).
    TB = _pick_batch_tile(B, Lp, K)
    Bp = pl.cdiv(B, TB) * TB
    if Bp != B:
        xcol = jnp.pad(xcol, ((0, (Bp - B) * Lp), (0, 0)))

    kernel = functools.partial(_cnn2d_fused_kernel, batch_tile=TB, l_pad=Lp)
    # NOTE: at production sizes, feed bf16 activations/weights on v6e/v7x for MXU rate;
    # f32 kept here to match the reference bit-for-bit at toy scale.
    out = pl.pallas_call(
        kernel,
        out_shape=jax.ShapeDtypeStruct((Bp, O), jnp.float32),
        grid=(Bp // TB,),
        in_specs=[
            pl.BlockSpec((TB * Lp, K), lambda i: (i, 0)),   # streamed per batch tile
            pl.BlockSpec((K, NF), lambda i: (0, 0)),        # resident across the grid
            pl.BlockSpec((1, NF), lambda i: (0, 0)),
            pl.BlockSpec((Lp, NF), lambda i: (0, 0)),
            pl.BlockSpec((NF, O), lambda i: (0, 0)),
            pl.BlockSpec((1, O), lambda i: (0, 0)),
        ],
        out_specs=pl.BlockSpec((TB, O), lambda i: (i, 0)),
        compiler_params=pltpu.CompilerParams(dimension_semantics=("parallel",)),
    )(xcol, w_all, b_all, mask, fc_wT, fc_b)
    return out[:B] if Bp != B else out


def cnn2d_reference(text, params, filter_sizes, multi_channel):
    """Plain-JAX reference for correctness checking (no Pallas)."""
    tokens = text.T
    chans = [params["embedding"][tokens]]
    if multi_channel:
        chans.append(params["embedding_multi"][tokens])
    x = jnp.stack(chans, axis=1)                      # (B, C, S, E)
    S = x.shape[2]
    max_fs = max(filter_sizes)
    if max_fs > S:
        x = jnp.pad(x, ((0, 0), (0, 0), (0, max_fs - S), (0, 0)))
    pooled = []
    for i, fs in enumerate(filter_sizes):
        w = params["conv_w"][i]
        b = params["conv_b"][i]
        L = x.shape[2] - fs + 1
        windows = jnp.stack([x[:, :, l:l + fs, :] for l in range(L)], axis=2)  # (B,C,L,fs,E)
        conv = jnp.einsum('bclte,fcte->bfl', windows, w) + b[None, :, None]
        pooled.append(jnp.max(jax.nn.relu(conv), axis=2))                      # (B, F)
    cat = jnp.concatenate(pooled, axis=1)
    return cat @ params["fc_w"].T + params["fc_b"]


def init_params(key, vocab_size, embedding_dim, n_filters, filter_sizes,
                output_dim, multi_channel, pad_idx):
    in_channels = 2 if multi_channel else 1
    keys = jax.random.split(key, 3 + len(filter_sizes))

    emb = jax.random.normal(keys[0], (vocab_size, embedding_dim), jnp.float32) * 0.1
    emb = emb.at[pad_idx].set(0.0)                    # padding_idx row is zero
    params = {"embedding": emb}
    if multi_channel:
        emb2 = jax.random.normal(keys[1], (vocab_size, embedding_dim), jnp.float32) * 0.1
        emb2 = emb2.at[pad_idx].set(0.0)
        params["embedding_multi"] = emb2

    conv_w, conv_b = [], []
    for i, fs_ in enumerate(filter_sizes):
        conv_w.append(jax.random.normal(
            keys[2 + i], (n_filters, in_channels, fs_, embedding_dim), jnp.float32) * 0.1)
        conv_b.append(jnp.full((n_filters,), 0.01, jnp.float32))
    params["conv_w"] = conv_w
    params["conv_b"] = conv_b

    k_fc = keys[2 + len(filter_sizes)]
    params["fc_w"] = jax.random.normal(
        k_fc, (output_dim, len(filter_sizes) * n_filters), jnp.float32) * 0.1
    params["fc_b"] = jnp.zeros((output_dim,), jnp.float32)
    return params


if __name__ == "__main__":
    # Small shapes consistent with the module's forward.
    vocab_size, embedding_dim = 50, 32
    n_filters = 8
    filter_sizes = (2, 3, 4)
    output_dim = 3
    multi_channel = True
    pad_idx = 0
    seq_len, batch = 8, 2

    key = jax.random.PRNGKey(0)
    k_tok, k_par = jax.random.split(key)
    params = init_params(k_par, vocab_size, embedding_dim, n_filters, filter_sizes,
                         output_dim, multi_channel, pad_idx)
    # text: [seq_len, batch] integer token ids (PyTorch layout before permute).
    text = jax.random.randint(k_tok, (seq_len, batch), 0, vocab_size, dtype=jnp.int32)

    out = cnn2d_forward(text, params, filter_sizes, multi_channel)
    out = jax.block_until_ready(out)
    assert out.shape == (batch, output_dim) and out.dtype == jnp.float32

    ref = jax.block_until_ready(cnn2d_reference(text, params, filter_sizes, multi_channel))
    assert jnp.allclose(out, ref, atol=1e-3, rtol=1e-3), (out, ref)
    print("KERNEL_OK")
</pallas_src>

<mosaic_0001>
module attributes {stable_mosaic.version = 11 : i64} {
  func.func @_cnn2d_fused_kernel(%arg0: i32, %arg1: memref<16x256xf32, #tpu.memory_space<vmem>>, %arg2: memref<256x24xf32, #tpu.memory_space<vmem>>, %arg3: memref<1x24xf32, #tpu.memory_space<vmem>>, %arg4: memref<8x24xf32, #tpu.memory_space<vmem>>, %arg5: memref<24x3xf32, #tpu.memory_space<vmem>>, %arg6: memref<1x3xf32, #tpu.memory_space<vmem>>, %arg7: memref<2x3xf32, #tpu.memory_space<vmem>>) attributes {dimension_semantics = [#tpu.dimension_semantics<parallel>], iteration_bounds = array<i64: 1>, scalar_prefetch = 0 : i64, scratch_operands = 0 : i64, tpu.core_type = #tpu.core_type<tc>, window_params = [{transform_indices = @transform_0, window_bounds = array<i64: 16, 256>}, {pipeline_mode = #tpu.pipeline_mode<synchronous>, transform_indices = @transform_1, window_bounds = array<i64: 256, 24>}, {pipeline_mode = #tpu.pipeline_mode<synchronous>, transform_indices = @transform_2, window_bounds = array<i64: 1, 24>}, {pipeline_mode = #tpu.pipeline_mode<synchronous>, transform_indices = @transform_3, window_bounds = array<i64: 8, 24>}, {pipeline_mode = #tpu.pipeline_mode<synchronous>, transform_indices = @transform_4, window_bounds = array<i64: 24, 3>}, {pipeline_mode = #tpu.pipeline_mode<synchronous>, transform_indices = @transform_5, window_bounds = array<i64: 1, 3>}, {transform_indices = @transform_6, window_bounds = array<i64: 2, 3>}]} {
    %c0 = arith.constant 0 : index
    %c0_0 = arith.constant 0 : index
    %0 = vector.load %arg1[%c0, %c0_0] : memref<16x256xf32, #tpu.memory_space<vmem>>, vector<16x256xf32>
    %c0_1 = arith.constant 0 : index
    %c0_2 = arith.constant 0 : index
    %1 = vector.load %arg2[%c0_1, %c0_2] : memref<256x24xf32, #tpu.memory_space<vmem>>, vector<256x24xf32>
    %cst = arith.constant dense<0.000000e+00> : vector<16x24xf32>
    %2 = tpu.matmul %0, %1, %cst {dimension_numbers = #tpu.dot_dimension_numbers<[1], [0], [0], [1], [0, 0, 1, 1], [], []>} : vector<16x256xf32>, vector<256x24xf32>, vector<16x24xf32> -> vector<16x24xf32>
    %c0_3 = arith.constant 0 : index
    %c0_4 = arith.constant 0 : index
    %3 = vector.load %arg3[%c0_3, %c0_4] : memref<1x24xf32, #tpu.memory_space<vmem>>, vector<1x24xf32>
    %4 = vector.broadcast %3 : vector<1x24xf32> to vector<16x24xf32>
    %5 = arith.addf %2, %4 : vector<16x24xf32>
    %cst_5 = arith.constant 0.000000e+00 : f32
    %6 = vector.broadcast %cst_5 : f32 to vector<16x24xf32>
    %7 = arith.maximumf %5, %6 : vector<16x24xf32>
    %8 = vector.shape_cast %7 : vector<16x24xf32> to vector<2x8x24xf32>
    %c0_6 = arith.constant 0 : index
    %c0_7 = arith.constant 0 : index
    %9 = vector.load %arg4[%c0_6, %c0_7] : memref<8x24xf32, #tpu.memory_space<vmem>>, vector<8x24xf32>
    %10 = vector.shape_cast %9 : vector<8x24xf32> to vector<1x8x24xf32>
    %11 = vector.broadcast %10 : vector<1x8x24xf32> to vector<2x8x24xf32>
    %12 = arith.addf %8, %11 : vector<2x8x24xf32>
    %cst_8 = arith.constant dense<0xFF800000> : vector<2x24xf32>
    %13 = vector.multi_reduction <maximumf>, %12, %cst_8 [1] : vector<2x8x24xf32> to vector<2x24xf32>
    %c0_9 = arith.constant 0 : index
    %c0_10 = arith.constant 0 : index
    %14 = vector.load %arg5[%c0_9, %c0_10] : memref<24x3xf32, #tpu.memory_space<vmem>>, vector<24x3xf32>
    %cst_11 = arith.constant dense<0.000000e+00> : vector<2x3xf32>
    %15 = tpu.matmul %13, %14, %cst_11 {dimension_numbers = #tpu.dot_dimension_numbers<[1], [0], [0], [1], [0, 0, 1, 1], [], []>} : vector<2x24xf32>, vector<24x3xf32>, vector<2x3xf32> -> vector<2x3xf32>
    %c0_12 = arith.constant 0 : index
    %c0_13 = arith.constant 0 : index
    %16 = vector.load %arg6[%c0_12, %c0_13] : memref<1x3xf32, #tpu.memory_space<vmem>>, vector<1x3xf32>
    %17 = vector.broadcast %16 : vector<1x3xf32> to vector<2x3xf32>
    %18 = arith.addf %15, %17 : vector<2x3xf32>
    %c0_14 = arith.constant 0 : index
    %c0_15 = arith.constant 0 : index
    %19 = vector.load %arg7[%c0_14, %c0_15] : memref<2x3xf32, #tpu.memory_space<vmem>>, vector<2x3xf32>
    tpu.vector_store %arg7[%c0_14, %c0_15], %18 {strides = array<i32>} : memref<2x3xf32, #tpu.memory_space<vmem>>, vector<2x3xf32>,
    return
  }
  func.func @transform_0(%arg0: i32) -> (i32, i32) {
    %c0_i32 = arith.constant 0 : i32
    %c0_i32_0 = arith.constant 0 : i32
    return %arg0, %c0_i32 : i32, i32
  }
  func.func @transform_1(%arg0: i32) -> (i32, i32) {
    %c0_i32 = arith.constant 0 : i32
    %c0_i32_0 = arith.constant 0 : i32
    %c0_i32_1 = arith.constant 0 : i32
    return %c0_i32, %c0_i32_0 : i32, i32
  }
  func.func @transform_2(%arg0: i32) -> (i32, i32) {
    %c0_i32 = arith.constant 0 : i32
    %c0_i32_0 = arith.constant 0 : i32
    %c0_i32_1 = arith.constant 0 : i32
    return %c0_i32, %c0_i32_0 : i32, i32
  }
  func.func @transform_3(%arg0: i32) -> (i32, i32) {
    %c0_i32 = arith.constant 0 : i32
    %c0_i32_0 = arith.constant 0 : i32
    %c0_i32_1 = arith.constant 0 : i32
    return %c0_i32, %c0_i32_0 : i32, i32
  }
  func.func @transform_4(%arg0: i32) -> (i32, i32) {
    %c0_i32 = arith.constant 0 : i32
    %c0_i32_0 = arith.constant 0 : i32
    %c0_i32_1 = arith.constant 0 : i32
    return %c0_i32, %c0_i32_0 : i32, i32
  }
  func.func @transform_5(%arg0: i32) -> (i32, i32) {
    %c0_i32 = arith.constant 0 : i32
    %c0_i32_0 = arith.constant 0 : i32
    %c0_i32_1 = arith.constant 0 : i32
    return %c0_i32, %c0_i32_0 : i32, i32
  }
  func.func @transform_6(%arg0: i32) -> (i32, i32) {
    %c0_i32 = arith.constant 0 : i32
    %c0_i32_0 = arith.constant 0 : i32
    return %arg0, %c0_i32 : i32, i32
  }
}

</mosaic_0001>

<bundles_post_ra>
// kernel: tpu_custom_call.1
= control target key start
LH: loop header
LB: loop body
LE: loop exit
PB: predicated region body
PF: predicated region fallthrough
CT: control target
= control target key end

     0   :  { %s561_s0 = inlined_call_operand.vmem [shape: f32[16,256], index: 0, kind: input, shape index: {}]   ;;  %s562_s1 = inlined_call_operand.vmem [shape: f32[256,24], index: 1, kind: input, shape index: {}]   ;;  %s563_s2 = inlined_call_operand.vmem [shape: f32[1,24], index: 2, kind: input, shape index: {}]   ;;  %s564_s3 = inlined_call_operand.vmem [shape: f32[8,24], index: 3, kind: input, shape index: {}]   ;;  %s565_s4 = inlined_call_operand.vmem [shape: f32[24,3], index: 4, kind: input, shape index: {}]   ;;  %s566_s5 = inlined_call_operand.vmem [shape: f32[1,3], index: 5, kind: input, shape index: {}]   ;;  %s567_s6 = inlined_call_operand.hbm [shape: f32[2,3], index: 6, kind: output, shape index: {}]  }
   0x1   :  { %v44_v0 = vld [vmem:[%s562_s1 + $0x80] sm:$0xff]  ;;  %v45_v1 = vld [vmem:[%s562_s1 + $0x88] sm:$0xff]  ;;  %v46_v5 = vld [vmem:[%s562_s1 + $0x90] sm:$0xff] }
   0x2   :  { %v28_v2 = vld [vmem:[%s562_s1] sm:$0xff]  ;;  %v318_v3 = vpack.c.bf16 %v45_v1, %v44_v0  ;;  %v29_v4 = vld [vmem:[%s562_s1 + $0x8] sm:$0xff]  ;;  %v47_v6 = vld [vmem:[%s562_s1 + $0x98] sm:$0xff] }
   0x3   :  { %v320_v7 = vpack.c.bf16 %v29_v4, %v28_v2  ;;  %v322_v8 = vpack.c.bf16 %v47_v6, %v46_v5  ;;  %v30_v9 = vld [vmem:[%s562_s1 + $0x10] sm:$0xff]  ;;  %v31_v10 = vld [vmem:[%s562_s1 + $0x18] sm:$0xff]  ;;  %v48_v11 = vld [vmem:[%s562_s1 + $0xa0] sm:$0xff] }
   0x4   :  { %319 = vmatprep.subr.bf16.mxu0 %v318_v3  ;;  %v49_v12 = vld [vmem:[%s562_s1 + $0xa8] sm:$0xff]  ;;  %v324_v13 = vpack.c.bf16 %v31_v10, %v30_v9  ;;  %v32_v15 = vld [vmem:[%s562_s1 + $0x20] sm:$0xff]  ;;  %v50_v17 = vld [vmem:[%s562_s1 + $0xb0] sm:$0xff] }
   0x5   :  { %321 = vmatpush3.bf16.msra.mxu0 %v320_v7  ;;  %v326_v14 = vpack.c.bf16 %v49_v12, %v48_v11  ;;  %v33_v16 = vld [vmem:[%s562_s1 + $0x28] sm:$0xff]  ;;  %v51_v18 = vld [vmem:[%s562_s1 + $0xb8] sm:$0xff]  ;;  %v34_v21 = vld [vmem:[%s562_s1 + $0x30] sm:$0xff] }
   0x6   :  { %323 = vmatprep.subr.bf16.mxu0 %v322_v8  ;;  %v328_v19 = vpack.c.bf16 %v33_v16, %v32_v15  ;;  %v330_v20 = vpack.c.bf16 %v51_v18, %v50_v17  ;;  %v35_v22 = vld [vmem:[%s562_s1 + $0x38] sm:$0xff]  ;;  %v52_v23 = vld [vmem:[%s562_s1 + $0xc0] sm:$0xff]  ;;  %v53_v24 = vld [vmem:[%s562_s1 + $0xc8] sm:$0xff] }
   0x7   :  { %v25_v25 = vld [vmem:[%s561_s0 + $0x8] sm:$0xff]  ;;  %v332_v26 = vpack.c.bf16 %v35_v22, %v34_v21 }
   0x8   :  { %131 = vmatprep.mubr.f32.mxu0 %v25_v25 }
   0x9   :  { %325 = vmatpush3.bf16.msra.mxu0 %v324_v13 }
   0xa   :  { %327 = vmatprep.subr.bf16.mxu0 %v326_v14 }
   0xd   :  { %329 = vmatpush3.bf16.msra.mxu0 %v328_v19 }
   0xe   :  { %11 = vsyncpa [#allocation3], 0  ;;  %331 = vmatprep.subr.bf16.mxu0 %v330_v20  ;;  %v334_v27 = vpack.c.bf16 %v53_v24, %v52_v23  ;;  %v36_v28 = vld [vmem:[%s562_s1 + $0x40] sm:$0xff]  ;;  %v37_v29 = vld [vmem:[%s562_s1 + $0x48] sm:$0xff]  ;;  %v381_v54 = vmov 0.0|0.0   ;;  %vm382_vm0 = vmmov 0  }
   0xf   :  { %v54_v30 = vld [vmem:[%s562_s1 + $0xd0] sm:$0xff]  ;;  %v55_v31 = vld [vmem:[%s562_s1 + $0xd8] sm:$0xff]  ;;  %v336_v32 = vpack.c.bf16 %v37_v29, %v36_v28  ;;  %v56_v36 = vld [vmem:[%s562_s1 + $0xe0] sm:$0xff]  ;;  %350 = vmatprep.subr.bf16.mxu1 %v381_v54  ;;  %v383_v56 = vmov 0.0   ;;  %vm147_vm1 = vcmask 195584   ;;  %vm174_vm2 = vcmask 1041409  }
  0x10   :  { %v338_v33 = vpack.c.bf16 %v55_v31, %v54_v30  ;;  %v38_v34 = vld [vmem:[%s562_s1 + $0x50] sm:$0xff]  ;;  %v39_v35 = vld [vmem:[%s562_s1 + $0x58] sm:$0xff]  ;;  %v57_v37 = vld [vmem:[%s562_s1 + $0xe8] sm:$0xff]  ;;  %315 = vmatprep.mubr.msk.f32.mxu1 %vm382_vm0, %v383_v56  ;;  %vm248_vm3 = vcmask 17408  }
  0x11   :  { %333 = vmatpush3.bf16.msra.mxu0 %v332_v26  ;;  %v340_v38 = vpack.c.bf16 %v39_v35, %v38_v34  ;;  %v342_v39 = vpack.c.bf16 %v57_v37, %v56_v36  ;;  %v40_v40 = vld [vmem:[%s562_s1 + $0x60] sm:$0xff]  ;;  %v41_v41 = vld [vmem:[%s562_s1 + $0x68] sm:$0xff]  ;;  %v58_v42 = vld [vmem:[%s562_s1 + $0xf0] sm:$0xff] }
  0x12   :  { %335 = vmatprep.subr.bf16.mxu0 %v334_v27  ;;  %v59_v43 = vld [vmem:[%s562_s1 + $0xf8] sm:$0xff]  ;;  %v344_v44 = vpack.c.bf16 %v41_v41, %v40_v40  ;;  %v42_v46 = vld [vmem:[%s562_s1 + $0x70] sm:$0xff]  ;;  %v24_v49 = vld [vmem:[%s561_s0] sm:$0xff] }
  0x13   :  { %v346_v45 = vpack.c.bf16 %v59_v43, %v58_v42  ;;  %v43_v47 = vld [vmem:[%s562_s1 + $0x78] sm:$0xff]  ;;  %v26_v51 = vld [vmem:[%s561_s0 + $0x10] sm:$0xff]  ;;  %v162_v52 = vld [vmem:[%s565_s4] sm:$0xff] }
  0x14   :  { %v348_v48 = vpack.c.bf16 %v43_v47, %v42_v46  ;;  %v27_v50 = vld [vmem:[%s561_s0 + $0x18] sm:$0xff]  ;;  %v163_v53 = vld [vmem:[%s565_s4 + $0x8] sm:$0xff]  ;;  %v164_v57 = vld [vmem:[%s565_s4 + $0x10] sm:$0xff]  ;;  %s384_s4 = smov [#allocation2]  }
  0x15   :  { %337 = vmatpush3.bf16.msra.mxu0 %v336_v32  ;;  %v351_v55 = vpack.c.bf16 %v163_v53, %v162_v52  ;;  %v264_v59 = vld [vmem:[%s563_s2] ss:$0 sm:$0xff]  ;;  %s256_s29 = sshll.u32 %s384_s4, 4  ;;  %s257_s29 = int_to_ptr.vmem [resolvable:$true] %s256_s29 }
  0x16   :  { %339 = vmatprep.subr.bf16.mxu0 %v338_v33  ;;  %v144_v0 = vld [vmem:[%s564_s3] sm:$0xff]  ;;  %s357_s30 = scalar_lea.vmem %s257_s29, 32  ;;  %p362_p1 = scmp.lt.s32.totalorder %s257_s29, %s257_s29 }
  0x17   :  { %352 = vmatpush3.bf16.msra.mxu1 %v351_v55  ;;  %v265_v23 = vld [vmem:[%s566_s5] ss:$0 sm:$0xff]  ;;  %p358_p0 = scmp.ne.s32.totalorder %s257_s29, %s357_s30  ;;  %p363_p2 = scmp.lt.s32.totalorder %s357_s30, %s357_s30 }
  0x18   :  { %313 = vmatprep.subr.mxu1 %v383_v56 }
  0x19   :  { %341 = vmatpush3.bf16.msra.mxu0 %v340_v38  ;;  %p364_p3 = por %p363_p2, %p362_p1 }
  0x1a   :  { %343 = vmatprep.subr.bf16.mxu0 %v342_v39 }
  0x1b   :  { %314 = vmatpush3.msra.mxu1 %v164_v57  ;;  %p365_p4 = pnand %p364_p3, %p358_p0 }
  0x1d   :  { %345 = vmatpush3.bf16.msra.mxu0 %v344_v44 }
  0x1e   :  { %347 = vmatprep.subr.bf16.mxu0 %v346_v45 }
  0x21   :  { %349 = vmatpush3.bf16.msra.mxu0 %v348_v48 }
  0x24   :  { %132 = vmatmul.mubr.f32.vlgmr.msra.gmra.mrb[0].mxu0 %v24_v49 }
  0x25   :  { %136 = vmatprep.mubr.f32.mxu0 %v27_v50 }
  0x28   :  { %137 = vmatmul.mubr.f32.gmra.mrb[2].mxu0 %v26_v51 }
  0xf7   :  { %v299_v58 = vpop.f32.mrb[0].mxu0 }
  0xf8   :  { %v300_v60 = vpop.f32.mrb[1].mxu0 }
  0xf9   :  { %v301_v61 = vadd.f32 %v300_v60, %v299_v58 }
  0xfb   :  { %v134_v62 = vadd.f32 %v301_v61, %v264_v59  ;;  %v302_v63 = vpop.f32.mrb[2].mxu0 }
  0xfc   :  { %v303_v1 = vpop.f32.mrb[3].mxu0 }
  0xfd   :  { %v142_v2 = vmax.f32 %v134_v62, 0.0  ;;  %v304_v3 = vadd.f32 %v303_v1, %v302_v63 }
  0xff   :  { %v145_v4 = vadd.f32 %v144_v0, %v142_v2  ;;  %v139_v5 = vadd.f32 %v304_v3, %v264_v59 }
 0x101   :  { %v143_v6 = vmax.f32 %v139_v5, 0.0  ;;  %v148_v7 = vsel %vm147_vm1, %v145_v4, -inf }
 0x102   :  { %v149_v8 = vrot.slane %v148_v7, 4 }
 0x103   :  { %v146_v9 = vadd.f32 %v144_v0, %v143_v6 }
 0x104   :  { %v150_v10 = vmax.f32 %v148_v7, %v149_v8 }
 0x105   :  { %v155_v11 = vsel %vm147_vm1, %v146_v9, -inf }
 0x106   :  { %v151_v12 = vrot.slane %v150_v10, 2  ;;  %v156_v13 = vrot.slane %v155_v11, 4 }
 0x108   :  { %v152_v14 = vmax.f32 %v150_v10, %v151_v12  ;;  %v157_v15 = vmax.f32 %v155_v11, %v156_v13 }
 0x10a   :  { %v158_v16 = vrot.slane %v157_v15, 2  ;;  %v153_v17 = vrot.slane %v152_v14, 1 }
 0x10c   :  { %v159_v18 = vmax.f32 %v157_v15, %v158_v16  ;;  %v154_v20 = vmax.f32 %v152_v14, %v153_v17 }
 0x10e   :  { %v160_v19 = vrot.slane %v159_v18, 1 }
 0x110   :  { %v161_v21 = vmax.f32 %v159_v18, %v160_v19 }
 0x112   :  { %v175_v22 = vsel %vm174_vm2, %v161_v21, %v154_v20 }
 0x113   :  { %316 = vmatmul.mubr.msk.f32.vlgmr.msra.gmra.mrb[0].mxu1 %vm147_vm1, %v175_v22 }
 0x1e6   :  { %v244_v24 = vpop.f32.mrb[0].mxu1 }
 0x1e7   :  { %v245_v25 = vadd.f32 %v265_v23, %v244_v24  ;;  %v317_v26 = vpop.f32.mrb[1].mxu1 }
 0x1e9   :  { %249 = vst.msk [vmem:[#allocation2] sm:$0x3] %vm248_vm3, %v245_v25 }
 0x1ea   :  { %368 = shalt.err (!%p365_p4)
}
 0x1eb   :  { %s369_s9 = scalar_lea.hbm %s567_s6, 32 }
 0x1ec   :  { %p370_p5 = scmp.ne.s32.totalorder %s567_s6, %s369_s9  ;;  %p373_p6 = scmp.lt.u32.totalorder %s369_s9, %s567_s6 }
 0x1ee   :  { %p375_p7 = pnand %p373_p6, %p370_p5 }
 0x1f0   :  { %378 = shalt.err (!%p375_p7)
}
 0x1f1   :  { %259 = dma.vmem_to_hbm [thread:$0]  %s257_s29, 32, %s567_s6, [#allocation3]  }
 0x1f2   :  { %379 = dma.done.wait [#allocation3], 32  }
 0x1f3   :  { %380 = vsyncadd [#allocation3], 4294967264 }
 0x1f4   :  { %263 = vsyncpa [#allocation3], 1 }

</bundles_post_ra>
